<compile_context>
chip_gen: v5e
topology: v5e:2x2
jax: 0.10.0
libtpu: 0.0.40
codegen_flags: <defaults>
</compile_context>

<pallas_src>
import jax
import jax.numpy as jnp
from jax.experimental import pallas as pl
from jax.experimental.pallas import tpu as pltpu

NB_CONVS = 3
LANE = 128


def _cdiv(a, b):
    return -(-a // b)


def _round_up(a, b):
    return _cdiv(a, b) * b


def _tensorcores_per_device():
    """TensorCores addressed by one JAX device (v7x / megacore = 2, else 1)."""
    try:
        kind = jax.devices()[0].device_kind.lower()
    except Exception:
        return 1
    # Single-TC-per-device chips.
    for tag in ("v5 lite", "v5e", "v5lite", "v6 lite", "v6e", "v2", "v3"):
        if tag in kind:
            return 1
    # Dual-TC / megacore devices.
    for tag in ("v7", "v4", "v5p"):
        if tag in kind:
            return 2
    return 1


def postnet_kernel(x_ref, w_ref, b_ref, wl_ref, bl_ref, o_ref):
    """One grid step processes a (C, tile_hw) channels-major tile of pixels.

    x_ref : (C, T)             input pixels, f32 (cast in-kernel)
    w_ref : (NB_CONVS, C, C)   BN-folded conv weights, (C_out, C_in), compute dtype
    b_ref : (NB_CONVS, C, 1)   BN-folded conv biases, f32
    wl_ref: (nb_classes, C)    logits conv weight, compute dtype
    bl_ref: (nb_classes, 1)    logits conv bias, f32
    o_ref : (nb_classes, T)    output logits tile (lane-dense last dim), f32
    """
    # In-kernel f32 -> compute-dtype cast: avoids a separate XLA convert pass
    # (an extra HBM round trip) before the kernel; the VPU cast hides under DMA.
    h = x_ref[...].astype(w_ref.dtype)
    for i in range(NB_CONVS):  # static unroll over the tiny conv stack
        z = jnp.dot(w_ref[i], h, preferred_element_type=jnp.float32)   # MXU
        z = jnp.maximum(z + b_ref[i], 0.0)                             # f32 bias+ReLU
        h = z.astype(w_ref.dtype)          # back to compute dtype for next MXU pass
    logits = jnp.dot(wl_ref[...], h, preferred_element_type=jnp.float32)
    o_ref[...] = (logits + bl_ref[...]).astype(o_ref.dtype)


def postnet_pallas(x_nchw, params, *, tile_hw=4096, compute_dtype=jnp.bfloat16,
                   eps=1e-5, vmem_budget_bytes=8 * 1024 * 1024):
    """Run PostNet forward. x_nchw: (N, C, H, W) float32 -> (N, nb_classes, H, W)."""
    N, C, H, W = x_nchw.shape
    nb_classes = params["wl"].shape[0]
    HW = H * W

    # --- glue: fold BN (inference) into conv weights/biases (f32), cast for MXU ---
    s = params["bn_gamma"] / jnp.sqrt(params["bn_var"] + eps)                  # (L, C)
    w_k = (params["w"] * s[:, :, None]).astype(compute_dtype)                  # (L, C_out, C_in)
    b_k = ((s * (params["b"] - params["bn_mean"]) + params["bn_beta"])
           [:, :, None].astype(jnp.float32))                                   # (L, C, 1)
    wl_k = params["wl"].astype(compute_dtype)                                  # (nb_classes, C)
    bl_k = params["bl"][:, None].astype(jnp.float32)                           # (nb_classes, 1)

    # --- pixel tile: lane-dense (multiple of 128), as large as the VMEM budget
    #     allows so the ~0.35us per-grid-step overhead and the 4 MXU weight
    #     pushes per step are amortized over many lanes.
    in_bpe = jnp.dtype(x_nchw.dtype).itemsize     # input read in its own dtype (f32 = 4 B)
    out_bpe = 4                                   # f32 logits output
    per_lane_bytes = 2 * (C * in_bpe + nb_classes * out_bpe)   # double-buffered in + out
    tile_cap = max(LANE, (vmem_budget_bytes // per_lane_bytes // LANE) * LANE)

    tile = min(tile_hw, tile_cap, _round_up(HW, LANE))
    tile = max(LANE, (tile // LANE) * LANE)

    # Multi-TC balancing: on 2-TC devices keep the step count a multiple of the
    # core count so neither core idles. On 1-TC chips (v5e/v6e) the grid is a
    # serial loop -> keep one big step per image (no shrinking, pure overhead).
    n_cores = _tensorcores_per_device()
    if n_cores > 1:
        while tile > LANE and (N * _cdiv(HW, tile)) % n_cores != 0:
            tile -= LANE

    grid_hw = _cdiv(HW, tile)

    # NCHW -> (N, C, H*W): free reshape, NO transpose, NO dtype convert, NO pad.
    x3 = x_nchw.reshape(N, C, HW)

    flops = int(N * HW * (NB_CONVS * 2 * C * C + 2 * nb_classes * C))
    bytes_accessed = int(N * C * HW * in_bpe + N * nb_classes * HW * out_bpe
                         + NB_CONVS * (C * C + C) * 4
                         + (nb_classes * C + nb_classes) * 4)

    out = pl.pallas_call(
        postnet_kernel,
        out_shape=jax.ShapeDtypeStruct((N, nb_classes, HW), jnp.float32),
        grid_spec=pltpu.PrefetchScalarGridSpec(
            num_scalar_prefetch=0,
            grid=(N, grid_hw),
            in_specs=[
                pl.BlockSpec((pl.Squeezed(), C, tile), lambda n, j: (n, 0, j)),
                # Constant operands: ~KiB total at C=32, so default double
                # buffering is negligible.
                # TODO(synk): single-buffer them (pl.Buffered(1) pipeline_mode)
                # if C ever grows large enough for their VMEM to matter.
                pl.BlockSpec((NB_CONVS, C, C), lambda n, j: (0, 0, 0)),
                pl.BlockSpec((NB_CONVS, C, 1), lambda n, j: (0, 0, 0)),
                pl.BlockSpec((nb_classes, C), lambda n, j: (0, 0)),
                pl.BlockSpec((nb_classes, 1), lambda n, j: (0, 0)),
            ],
            out_specs=pl.BlockSpec((pl.Squeezed(), nb_classes, tile),
                                   lambda n, j: (n, 0, j)),
        ),
        compiler_params=pltpu.CompilerParams(
            dimension_semantics=("parallel", "parallel")),
        cost_estimate=pl.CostEstimate(flops=flops, transcendentals=0,
                                      bytes_accessed=bytes_accessed),
    )(x3, w_k, b_k, wl_k, bl_k)

    return out.reshape(N, nb_classes, H, W)


def postnet_reference(x_nchw, params, eps=1e-5):
    """Plain-JAX f32 reference of the same forward (for correctness check)."""
    N, C, H, W = x_nchw.shape
    h = jnp.transpose(x_nchw, (0, 2, 3, 1)).reshape(-1, C)
    for i in range(NB_CONVS):
        h = h @ params["w"][i].T + params["b"][i]
        h = (h - params["bn_mean"][i]) / jnp.sqrt(params["bn_var"][i] + eps)
        h = h * params["bn_gamma"][i] + params["bn_beta"][i]
        h = jnp.maximum(h, 0.0)
    h = h @ params["wl"].T + params["bl"]
    nb_classes = params["wl"].shape[0]
    return jnp.transpose(h.reshape(N, H, W, nb_classes), (0, 3, 1, 2))


def init_params(key, in_channels, nb_classes):
    ks = jax.random.split(key, 8)
    scale = 1.0 / jnp.sqrt(in_channels)
    return {
        # 1x1 convs: weight (C_out, C_in), bias (C_out), stacked over layers
        "w": jax.random.uniform(ks[0], (NB_CONVS, in_channels, in_channels),
                                jnp.float32, -scale, scale),
        "b": jax.random.uniform(ks[1], (NB_CONVS, in_channels),
                                jnp.float32, -scale, scale),
        # BatchNorm2d params + running stats (inference mode)
        "bn_gamma": 1.0 + 0.1 * jax.random.normal(ks[2], (NB_CONVS, in_channels)),
        "bn_beta": 0.1 * jax.random.normal(ks[3], (NB_CONVS, in_channels)),
        "bn_mean": 0.1 * jax.random.normal(ks[4], (NB_CONVS, in_channels)),
        "bn_var": jnp.abs(1.0 + 0.1 * jax.random.normal(ks[5], (NB_CONVS, in_channels))),
        # final logits 1x1 conv
        "wl": jax.random.uniform(ks[6], (nb_classes, in_channels),
                                 jnp.float32, -scale, scale),
        "bl": jax.random.uniform(ks[7], (nb_classes,),
                                 jnp.float32, -scale, scale),
    }


if __name__ == "__main__":
    key = jax.random.PRNGKey(0)
    kx, kp = jax.random.split(key)

    N, C, H, W = 2, 32, 32, 32
    nb_classes = 8

    x = jax.random.normal(kx, (N, C, H, W), jnp.float32)
    params = init_params(kp, C, nb_classes)

    ref = postnet_reference(x, params)

    # Exact path: f32 end to end -> tight check against the f32 reference.
    out_f32 = jax.block_until_ready(
        postnet_pallas(x, params, compute_dtype=jnp.float32))
    assert out_f32.shape == (N, nb_classes, H, W)
    assert jnp.allclose(out_f32, ref, atol=1e-4, rtol=1e-4)

    # Fast path (default): bf16 MXU operands, f32 accumulation & elementwise.
    out = jax.block_until_ready(postnet_pallas(x, params))
    assert out.shape == (N, nb_classes, H, W)
    assert jnp.allclose(out, ref, atol=1e-1, rtol=1e-1)

    print("KERNEL_OK")
</pallas_src>

<mosaic_0001>
module attributes {stable_mosaic.version = 11 : i64} {
  func.func @postnet_kernel(%arg0: i32, %arg1: i32, %arg2: memref<1x32x1024xf32, #tpu.memory_space<vmem>>, %arg3: memref<3x32x32xf32, #tpu.memory_space<vmem>>, %arg4: memref<3x32x1xf32, #tpu.memory_space<vmem>>, %arg5: memref<8x32xf32, #tpu.memory_space<vmem>>, %arg6: memref<8x1xf32, #tpu.memory_space<vmem>>, %arg7: memref<1x8x1024xf32, #tpu.memory_space<vmem>>) attributes {dimension_semantics = [#tpu.dimension_semantics<parallel>, #tpu.dimension_semantics<parallel>], iteration_bounds = array<i64: 2, 1>, scalar_prefetch = 0 : i64, scratch_operands = 0 : i64, tpu.core_type = #tpu.core_type<tc>, window_params = [{transform_indices = @transform_0, window_bounds = array<i64: 1, 32, 1024>}, {pipeline_mode = #tpu.pipeline_mode<synchronous>, transform_indices = @transform_1, window_bounds = array<i64: 3, 32, 32>}, {pipeline_mode = #tpu.pipeline_mode<synchronous>, transform_indices = @transform_2, window_bounds = array<i64: 3, 32, 1>}, {pipeline_mode = #tpu.pipeline_mode<synchronous>, transform_indices = @transform_3, window_bounds = array<i64: 8, 32>}, {pipeline_mode = #tpu.pipeline_mode<synchronous>, transform_indices = @transform_4, window_bounds = array<i64: 8, 1>}, {transform_indices = @transform_5, window_bounds = array<i64: 1, 8, 1024>}]} {
    %c0 = arith.constant 0 : index
    %c0_0 = arith.constant 0 : index
    %c0_1 = arith.constant 0 : index
    %0 = vector.load %arg2[%c0, %c0_0, %c0_1] : memref<1x32x1024xf32, #tpu.memory_space<vmem>>, vector<1x32x1024xf32>
    %1 = vector.shape_cast %0 : vector<1x32x1024xf32> to vector<32x1024xf32>
    %c0_2 = arith.constant 0 : index
    %c0_3 = arith.constant 0 : index
    %c0_4 = arith.constant 0 : index
    %2 = vector.load %arg3[%c0_2, %c0_3, %c0_4] : memref<3x32x32xf32, #tpu.memory_space<vmem>>, vector<1x32x32xf32>
    %3 = vector.shape_cast %2 : vector<1x32x32xf32> to vector<32x32xf32>
    %cst = arith.constant dense<0.000000e+00> : vector<32x1024xf32>
    %4 = tpu.matmul %3, %1, %cst {dimension_numbers = #tpu.dot_dimension_numbers<[1], [0], [0], [1], [0, 0, 1, 1], [], []>} : vector<32x32xf32>, vector<32x1024xf32>, vector<32x1024xf32> -> vector<32x1024xf32>
    %c0_5 = arith.constant 0 : index
    %c0_6 = arith.constant 0 : index
    %c0_7 = arith.constant 0 : index
    %5 = vector.load %arg4[%c0_5, %c0_6, %c0_7] : memref<3x32x1xf32, #tpu.memory_space<vmem>>, vector<1x32x1xf32>
    %6 = vector.shape_cast %5 : vector<1x32x1xf32> to vector<32x1xf32>
    %7 = vector.broadcast %6 : vector<32x1xf32> to vector<32x1024xf32>
    %8 = arith.addf %4, %7 : vector<32x1024xf32>
    %cst_8 = arith.constant 0.000000e+00 : f32
    %9 = vector.broadcast %cst_8 : f32 to vector<32x1024xf32>
    %10 = arith.maximumf %8, %9 : vector<32x1024xf32>
    %c1 = arith.constant 1 : index
    %c0_9 = arith.constant 0 : index
    %c0_10 = arith.constant 0 : index
    %11 = vector.load %arg3[%c1, %c0_9, %c0_10] : memref<3x32x32xf32, #tpu.memory_space<vmem>>, vector<1x32x32xf32>
    %12 = vector.shape_cast %11 : vector<1x32x32xf32> to vector<32x32xf32>
    %cst_11 = arith.constant dense<0.000000e+00> : vector<32x1024xf32>
    %13 = tpu.matmul %12, %10, %cst_11 {dimension_numbers = #tpu.dot_dimension_numbers<[1], [0], [0], [1], [0, 0, 1, 1], [], []>} : vector<32x32xf32>, vector<32x1024xf32>, vector<32x1024xf32> -> vector<32x1024xf32>
    %c1_12 = arith.constant 1 : index
    %c0_13 = arith.constant 0 : index
    %c0_14 = arith.constant 0 : index
    %14 = vector.load %arg4[%c1_12, %c0_13, %c0_14] : memref<3x32x1xf32, #tpu.memory_space<vmem>>, vector<1x32x1xf32>
    %15 = vector.shape_cast %14 : vector<1x32x1xf32> to vector<32x1xf32>
    %16 = vector.broadcast %15 : vector<32x1xf32> to vector<32x1024xf32>
    %17 = arith.addf %13, %16 : vector<32x1024xf32>
    %cst_15 = arith.constant 0.000000e+00 : f32
    %18 = vector.broadcast %cst_15 : f32 to vector<32x1024xf32>
    %19 = arith.maximumf %17, %18 : vector<32x1024xf32>
    %c2 = arith.constant 2 : index
    %c0_16 = arith.constant 0 : index
    %c0_17 = arith.constant 0 : index
    %20 = vector.load %arg3[%c2, %c0_16, %c0_17] : memref<3x32x32xf32, #tpu.memory_space<vmem>>, vector<1x32x32xf32>
    %21 = vector.shape_cast %20 : vector<1x32x32xf32> to vector<32x32xf32>
    %cst_18 = arith.constant dense<0.000000e+00> : vector<32x1024xf32>
    %22 = tpu.matmul %21, %19, %cst_18 {dimension_numbers = #tpu.dot_dimension_numbers<[1], [0], [0], [1], [0, 0, 1, 1], [], []>} : vector<32x32xf32>, vector<32x1024xf32>, vector<32x1024xf32> -> vector<32x1024xf32>
    %c2_19 = arith.constant 2 : index
    %c0_20 = arith.constant 0 : index
    %c0_21 = arith.constant 0 : index
    %23 = vector.load %arg4[%c2_19, %c0_20, %c0_21] : memref<3x32x1xf32, #tpu.memory_space<vmem>>, vector<1x32x1xf32>
    %24 = vector.shape_cast %23 : vector<1x32x1xf32> to vector<32x1xf32>
    %25 = vector.broadcast %24 : vector<32x1xf32> to vector<32x1024xf32>
    %26 = arith.addf %22, %25 : vector<32x1024xf32>
    %cst_22 = arith.constant 0.000000e+00 : f32
    %27 = vector.broadcast %cst_22 : f32 to vector<32x1024xf32>
    %28 = arith.maximumf %26, %27 : vector<32x1024xf32>
    %c0_23 = arith.constant 0 : index
    %c0_24 = arith.constant 0 : index
    %29 = vector.load %arg5[%c0_23, %c0_24] : memref<8x32xf32, #tpu.memory_space<vmem>>, vector<8x32xf32>
    %cst_25 = arith.constant dense<0.000000e+00> : vector<8x1024xf32>
    %30 = tpu.matmul %29, %28, %cst_25 {dimension_numbers = #tpu.dot_dimension_numbers<[1], [0], [0], [1], [0, 0, 1, 1], [], []>} : vector<8x32xf32>, vector<32x1024xf32>, vector<8x1024xf32> -> vector<8x1024xf32>
    %c0_26 = arith.constant 0 : index
    %c0_27 = arith.constant 0 : index
    %31 = vector.load %arg6[%c0_26, %c0_27] : memref<8x1xf32, #tpu.memory_space<vmem>>, vector<8x1xf32>
    %32 = vector.broadcast %31 : vector<8x1xf32> to vector<8x1024xf32>
    %33 = arith.addf %30, %32 : vector<8x1024xf32>
    %c0_28 = arith.constant 0 : index
    %c0_29 = arith.constant 0 : index
    %c0_30 = arith.constant 0 : index
    %34 = vector.load %arg7[%c0_28, %c0_29, %c0_30] : memref<1x8x1024xf32, #tpu.memory_space<vmem>>, vector<1x8x1024xf32>
    %35 = vector.shape_cast %34 : vector<1x8x1024xf32> to vector<8x1024xf32>
    %36 = vector.shape_cast %33 : vector<8x1024xf32> to vector<1x8x1024xf32>
    tpu.vector_store %arg7[%c0_28, %c0_29, %c0_30], %36 {strides = array<i32>} : memref<1x8x1024xf32, #tpu.memory_space<vmem>>, vector<1x8x1024xf32>,
    return
  }
  func.func @transform_0(%arg0: i32, %arg1: i32) -> (i32, i32, i32) {
    %c0_i32 = arith.constant 0 : i32
    %c0_i32_0 = arith.constant 0 : i32
    return %arg0, %c0_i32, %arg1 : i32, i32, i32
  }
  func.func @transform_1(%arg0: i32, %arg1: i32) -> (i32, i32, i32) {
    %c0_i32 = arith.constant 0 : i32
    %c0_i32_0 = arith.constant 0 : i32
    %c0_i32_1 = arith.constant 0 : i32
    %c0_i32_2 = arith.constant 0 : i32
    return %c0_i32, %c0_i32_0, %c0_i32_1 : i32, i32, i32
  }
  func.func @transform_2(%arg0: i32, %arg1: i32) -> (i32, i32, i32) {
    %c0_i32 = arith.constant 0 : i32
    %c0_i32_0 = arith.constant 0 : i32
    %c0_i32_1 = arith.constant 0 : i32
    %c0_i32_2 = arith.constant 0 : i32
    return %c0_i32, %c0_i32_0, %c0_i32_1 : i32, i32, i32
  }
  func.func @transform_3(%arg0: i32, %arg1: i32) -> (i32, i32) {
    %c0_i32 = arith.constant 0 : i32
    %c0_i32_0 = arith.constant 0 : i32
    %c0_i32_1 = arith.constant 0 : i32
    return %c0_i32, %c0_i32_0 : i32, i32
  }
  func.func @transform_4(%arg0: i32, %arg1: i32) -> (i32, i32) {
    %c0_i32 = arith.constant 0 : i32
    %c0_i32_0 = arith.constant 0 : i32
    %c0_i32_1 = arith.constant 0 : i32
    return %c0_i32, %c0_i32_0 : i32, i32
  }
  func.func @transform_5(%arg0: i32, %arg1: i32) -> (i32, i32, i32) {
    %c0_i32 = arith.constant 0 : i32
    %c0_i32_0 = arith.constant 0 : i32
    return %arg0, %c0_i32, %arg1 : i32, i32, i32
  }
}

</mosaic_0001>

<bundles_post_ra>
// kernel: tpu_custom_call.1
= control target key start
LH: loop header
LB: loop body
LE: loop exit
PB: predicated region body
PF: predicated region fallthrough
CT: control target
= control target key end

     0   :  { %10 = vsyncpa [#allocation3], 0  ;;  %s2428_s0 = inlined_call_operand.hbm [shape: f32[2,32,1024], index: 0, kind: input, shape index: {}]   ;;  %s2429_s1 = inlined_call_operand.vmem [shape: f32[3,32,32], index: 1, kind: input, shape index: {}]   ;;  %s2430_s2 = inlined_call_operand.vmem [shape: f32[3,32,1], index: 2, kind: input, shape index: {}]   ;;  %s2431_s3 = inlined_call_operand.vmem [shape: f32[8,32], index: 3, kind: input, shape index: {}]   ;;  %s2432_s4 = inlined_call_operand.vmem [shape: f32[8,1], index: 4, kind: input, shape index: {}]   ;;  %s2433_s5 = inlined_call_operand.hbm [shape: f32[2,8,1024], index: 5, kind: output, shape index: {}]  }
   0x1   :  { %12 = vsyncpa [#allocation3 + $0x1], 0 }
   0x2   :  { %13 = vsyncpa [#allocation4], 0 }
   0x3   :  { %15 = vsyncpa [#allocation4 + $0x1], 0  ;;  %s1847_s18 = smov 0   ;;  %s1849_s19 = smov 0  }
   0x4   :  { %s1851_s20 = smov 0   ;;  %s1853_s21 = smov 0  }
   0x5   :  { %s1855_s22 = smov 0   ;;  %s1857_s23 = smov 0  }
   0x6 LB: > { %s1495_s24 = sadd.s32 4294967295, %s1812_s23   ;;  %s1496_s25 = sadd.s32 4294967294, %s1812_s23   ;;  %s1812_s23 = sphi %s1857_s23, %s21_s23   ;;  %s1808_s22 = sphi %s1855_s22, %s2442_s22   ;;  %s1804_s21 = sphi %s1853_s21, %s2441_s21   ;;  %s1800_s20 = sphi %s1851_s20, %s2440_s20   ;;  %s1796_s19 = sphi %s1849_s19, %s2439_s19   ;;  %s1792_s18 = sphi %s1847_s18, %s2438_s18  }
   0x7   : > { %s33_s26 = sadd.s32 1, %s1808_s22  ;;  %s42_s27 = sadd.s32 1, %s1800_s20 }
   0x8   : > { %p35_p0 = scmp.ge.s32.totalorder %s33_s26, 2  ;;  %p49_p1 = scmp.ne.s32.totalorder %s1800_s20, %s1796_s19 }
   0x9   : > { %p50_p2 = scmp.eq.s32.totalorder %s1812_s23, 0  ;;  %p55_p3 = scmp.ne.s32.totalorder %s1796_s19, %s1792_s18 }
   0xa   : > { %s2444_s26 = smov (%p35_p0, %s33_s26), 0  ;;  %p56_p5 = scmp.eq.s32.totalorder %s1495_s24, 0 }
   0xb   : > { %p1888_p4 = por %p50_p2, %p49_p1  ;;  %s37_s29 = ssub.s32 %s1808_s22, %s2444_s26 }
   0xc   : > { %p165_p6 = scmp.eq.s32.totalorder %s1495_s24, 1  ;;  %p40_p7 = scmp.eq.s32.totalorder %s37_s29, 0 }
   0xd   : > { %p1894_p8 = por %p56_p5, %p55_p3  ;;  %p171_p10 = scmp.eq.s32.totalorder %s1496_s25, 1 }
   0xe   : > { %p1898_p9 = por %p165_p6, %p49_p1  ;;  %p1498_p12 = scmp.ge.s32.totalorder %s1812_s23, 2 }
   0xf   : > { %s1903_s7 = scalar_select %p40_p7, %s1800_s20, %s42_s27  }
  0x10   : > { %p1905_p11 = por %p171_p10, %p55_p3  ;;  %p1644_p13 = scmp.lt.s32.totalorder %s1812_s23, 2 }
  0x11   : > { %s203_s9 = sand.u32 1, %s1800_s20   ;;  %s1630_s11 = sshll.u32 %s1808_s22, 8 }
  0x12   : > { %s1499_s10 = sshll.u32 %s203_s9, 8  ;;  %s214_s14 = scalar_lea.hbm %s2428_s0, %s1630_s11 }
  0x13   : > { %s207_s15 = scalar_lea.vmem [#allocation2], %s1499_s10  ;;  %s215_s17 = sshll.u32 %s214_s14, 4  ;;  %s216_s17 = int_to_ptr.hbm [resolvable:$true] %s215_s17 }
  0x14   : > { %s217_s16 = sshll.u32 %s207_s15, 4  ;;  %p1637_p0 = pnand %p1644_p13, %p1888_p4  ;;  %s218_s16 = int_to_ptr.vmem [resolvable:$true] %s217_s16 }
  0x15   : > { %p1502_p1 = scmp.ge.s32.totalorder %s1812_s23, 1  ;;  %s204_s24 = scalar_lea.sflag [#allocation3], %s203_s9 }
  0x16   : > { %s1814_s25 = smov 1024   ;;  %s1815_s27 = smov 64  }
  0x17   : > { %1639 = dma.hbm_to_vmem [thread:$0]  (!%p1637_p0), %s216_s17, 4096, %s218_s16, %s204_s24, %s1814_s25, %s1814_s25, %s1815_s27  }
  0x18   : > { %p225_p2 = scmp.lt.s32.totalorder %s1812_s23, 3 }
  0x1a   : > { %p226_p3 = pnand %p1502_p1, %p225_p2 }
  0x1b   : > { %s1921_s29 = sand.u32 (!%p226_p3), 1, %s1796_s19  }
  0x1c   : > { %229 = sbr.rel (%p226_p3) target bundleno = 717 (0x2cd), region = 40  ;;  %s1503_s10 = sshll.u32 (!%p226_p3), %s1921_s29, 8 }
  0x1d   : > { %s232_s11 = scalar_lea.sflag (!%p226_p3), [#allocation3], %s1921_s29  ;;  %s1925_s12 = scalar_lea.vmem (!%p226_p3), [#allocation2], %s1503_s10 }
  0x21   : > { %1783 = dma.done.wait (%p1894_p8), %s232_s11, 4096  }
  0x22   : > { %1785 = vsyncadd (%p1894_p8), %s232_s11, 4294963200  ;;  %v1816_v0 = vmov 0   ;;  %v289_v1 = vld [vmem:[%s1925_s12 + $0xc0] sm:$0xff]  ;;  %v290_v2 = vld [vmem:[%s1925_s12 + $0xc8] sm:$0xff]  ;;  %vm325_vm0 = vcmask 261120   ;;  %s1504_s27 = sshll.u32 %s1921_s29, 6 }
  0x23   : > { %1697 = vset.pattern.permute.xlu0 %v1816_v0  ;;  %1698 = vset.pattern.permute.xlu1 %v1816_v0  ;;  %v291_v3 = vld [vmem:[%s1925_s12 + $0xd0] sm:$0xff]  ;;  %v292_v4 = vld [vmem:[%s1925_s12 + $0xd8] sm:$0xff]  ;;  %v281_v5 = vld [vmem:[%s1925_s12 + $0x80] sm:$0xff]  ;;  %s262_s10 = scalar_lea.vmem [#allocation5], %s1504_s27  ;;  %s1631_s11 = sshll.u32 %s1804_s21, 6 }
  0x24   : > { %1699 = vset.pattern.permute.xlu2 %v1816_v0  ;;  %350 = vmatpush.msra.mxu0 %v289_v1  ;;  %v282_v6 = vld [vmem:[%s1925_s12 + $0x88] sm:$0xff]  ;;  %v283_v7 = vld [vmem:[%s1925_s12 + $0x90] sm:$0xff]  ;;  %v284_v8 = vld [vmem:[%s1925_s12 + $0x98] sm:$0xff]  ;;  %s1406_s9 = scalar_lea.hbm %s2433_s5, %s1631_s11  ;;  %s1408_s13 = sshll.u32 %s262_s10, 4  ;;  %s1409_s13 = int_to_ptr.vmem [resolvable:$true] %s1408_s13 }
  0x25   : > { %379 = vmatpush.msra.mxu1 %v290_v2  ;;  %408 = vmatpush.msra.mxu2 %v291_v3  ;;  %v273_v9 = vld [vmem:[%s1925_s12 + $0x40] sm:$0xff]  ;;  %v274_v10 = vld [vmem:[%s1925_s12 + $0x48] sm:$0xff]  ;;  %v275_v11 = vld [vmem:[%s1925_s12 + $0x50] sm:$0xff]  ;;  %s1410_s14 = sshll.u32 %s1406_s9, 4  ;;  %s1750_s24 = scalar_lea.hbm %s2433_s5, 128  ;;  %s1411_s14 = int_to_ptr.hbm [resolvable:$true] %s1410_s14 }
  0x26   : > { %437 = vmatpush.msra.mxu3 %v292_v4  ;;  %351 = vmatpush.msra.mxu0 %v281_v5  ;;  %v276_v12 = vld [vmem:[%s1925_s12 + $0x58] sm:$0xff]  ;;  %v265_v13 = vld [vmem:[%s1925_s12] sm:$0xff]  ;;  %v266_v14 = vld [vmem:[%s1925_s12 + $0x8] sm:$0xff]  ;;  %s1744_s15 = sshra.s32 %s1411_s14, 4  ;;  %s1745_s15 = int_to_ptr.hbm [resolvable:$true] %s1744_s15 }
  0x27   : > { %380 = vmatpush.msra.mxu1 %v282_v6  ;;  %409 = vmatpush.msra.mxu2 %v283_v7  ;;  %v267_v15 = vld [vmem:[%s1925_s12 + $0x10] sm:$0xff]  ;;  %v268_v16 = vld [vmem:[%s1925_s12 + $0x18] sm:$0xff]  ;;  %v1950_v17 = vld [vmem:[%s2429_s1] sm:$0xff]  ;;  %s1746_s16 = scalar_lea.hbm %s1745_s15, 64  ;;  %p1751_p7 = scmp.lt.s32.totalorder %s1745_s15, %s2433_s5 }
  0x28   : > { %438 = vmatpush.msra.mxu3 %v284_v8  ;;  %352 = vmatpush.msra.mxu0 %v273_v9  ;;  %v304_v18 = vld [vmem:[%s2430_s2 + $0x18] sm:$0xff]  ;;  %v302_v19 = vld [vmem:[%s2430_s2 + $0x8] sm:$0xff]  ;;  %v293_v20 = vld [vmem:[%s1925_s12 + $0xe0] sm:$0xff]  ;;  %p1747_p4 = scmp.ne.s32.totalorder %s1745_s15, %s1746_s16  ;;  %p1752_p8 = scmp.lt.s32.totalorder %s1750_s24, %s1746_s16 }
  0x29   : > { %381 = vmatpush.msra.mxu1 %v274_v10  ;;  %410 = vmatpush.msra.mxu2 %v275_v11  ;;  %v294_v21 = vld [vmem:[%s1925_s12 + $0xe8] sm:$0xff]  ;;  %v295_v22 = vld [vmem:[%s1925_s12 + $0xf0] sm:$0xff]  ;;  %v296_v23 = vld [vmem:[%s1925_s12 + $0xf8] sm:$0xff] }
  0x2a   : > { %439 = vmatpush.msra.mxu3 %v276_v12  ;;  %353 = vmatpush.msra.mxu0 %v265_v13  ;;  %v285_v24 = vld [vmem:[%s1925_s12 + $0xa0] sm:$0xff]  ;;  %v286_v25 = vld [vmem:[%s1925_s12 + $0xa8] sm:$0xff]  ;;  %v287_v26 = vld [vmem:[%s1925_s12 + $0xb0] sm:$0xff]  ;;  %p1748_p5 = pnand %p1747_p4, %p1898_p9  ;;  %p1753_p10 = por %p1752_p8, %p1751_p7 }
  0x2b   : > { %382 = vmatpush.msra.mxu1 %v266_v14  ;;  %411 = vmatpush.msra.mxu2 %v267_v15  ;;  %v288_v27 = vld [vmem:[%s1925_s12 + $0xb8] sm:$0xff]  ;;  %v277_v28 = vld [vmem:[%s1925_s12 + $0x60] sm:$0xff]  ;;  %v278_v29 = vld [vmem:[%s1925_s12 + $0x68] sm:$0xff] }
  0x2c   : > { %440 = vmatpush.msra.mxu3 %v268_v16  ;;  %1505 = vmatmul.msk.f32.vlgmr.msra.gmra.mxu0 %vm325_vm0, %v1950_v17  ;;  %v298_v30 = vld [vmem:[%s2429_s1 + $0x8] sm:$0xff]  ;;  %v303_v31 = vld [vmem:[%s2430_s2 + $0x10] sm:$0xff]  ;;  %v301_v32 = vld [vmem:[%s2430_s2] sm:$0xff]  ;;  %p1749_p6 = pneg %p1748_p5 }
  0x2d   : > { %1509 = vmatmul.msk.f32.vlgmr.msra.gmra.mxu1 %vm325_vm0, %v1950_v17  ;;  %1513 = vmatmul.msk.f32.vlgmr.msra.gmra.mxu2 %vm325_vm0, %v1950_v17  ;;  %v279_v33 = vld [vmem:[%s1925_s12 + $0x70] sm:$0xff]  ;;  %v280_v34 = vld [vmem:[%s1925_s12 + $0x78] sm:$0xff]  ;;  %v269_v35 = vld [vmem:[%s1925_s12 + $0x20] sm:$0xff] }
  0x2e   : > { %1517 = vmatmul.msk.f32.vlgmr.msra.gmra.mxu3 %vm325_vm0, %v1950_v17  ;;  %322 = vperm.xlu0 %1697, %v304_v18   ;;  %v270_v36 = vld [vmem:[%s1925_s12 + $0x28] sm:$0xff]  ;;  %v271_v37 = vld [vmem:[%s1925_s12 + $0x30] sm:$0xff]  ;;  %v272_v38 = vld [vmem:[%s1925_s12 + $0x38] sm:$0xff]  ;;  %s1393_s12 = scalar_lea.sflag [#allocation4], %s1921_s29  ;;  %p1754_p13 = pnand %p1753_p10, %p1749_p6 }
  0x2f   : > { %312 = vperm.xlu1 %1698, %v302_v19   ;;  %466 = vmatpush.msrb.mxu0 %v293_v20  ;;  %v299_v39 = vld [vmem:[%s2429_s1 + $0x10] sm:$0xff]  ;;  %v1542_v40 = vld [vmem:[%s2430_s2 + $0x28] sm:$0xff]  ;;  %v1541_v41 = vld [vmem:[%s2430_s2 + $0x20] sm:$0xff] }
  0x30   : > { %495 = vmatpush.msrb.mxu1 %v294_v21  ;;  %524 = vmatpush.msrb.mxu2 %v295_v22  ;;  %v300_v42 = vld [vmem:[%s2429_s1 + $0x18] sm:$0xff]  ;;  %v1583_v43 = vld [vmem:[%s2430_s2 + $0x50] sm:$0xff]  ;;  %v1582_v44 = vld [vmem:[%s2430_s2 + $0x48] sm:$0xff] }
  0x31   : > { %553 = vmatpush.msrb.mxu3 %v296_v23  ;;  %467 = vmatpush.msrb.mxu0 %v285_v24  ;;  %v1215_v45 = vld [vmem:[%s2432_s4] sm:$0xff] }
  0x32   : > { %496 = vmatpush.msrb.mxu1 %v286_v25  ;;  %525 = vmatpush.msrb.mxu2 %v287_v26 }
  0x33   : > { %554 = vmatpush.msrb.mxu3 %v288_v27  ;;  %468 = vmatpush.msrb.mxu0 %v277_v28  ;;  %v2072_v27 = vld [vmem:[%s2429_s1 + $0x20] sm:$0xff] }
  0x34   : > { %497 = vmatpush.msrb.mxu1 %v278_v29  ;;  %1506 = vmatmul.msk.f32.gmra.mxu0 %vm325_vm0, %v298_v30 }
  0x35   : > { %1510 = vmatmul.msk.f32.gmra.mxu1 %vm325_vm0, %v298_v30  ;;  %1514 = vmatmul.msk.f32.gmra.mxu2 %vm325_vm0, %v298_v30 }
  0x36   : > { %1518 = vmatmul.msk.f32.gmra.mxu3 %vm325_vm0, %v298_v30  ;;  %317 = vperm.xlu0 %1697, %v303_v31  }
  0x37   : > { %307 = vperm.xlu1 %1698, %v301_v32   ;;  %526 = vmatpush.msrb.mxu2 %v279_v33 }
  0x38   : > { %555 = vmatpush.msrb.mxu3 %v280_v34  ;;  %469 = vmatpush.msrb.mxu0 %v269_v35 }
  0x39   : > { %498 = vmatpush.msrb.mxu1 %v270_v36  ;;  %527 = vmatpush.msrb.mxu2 %v271_v37 }
  0x3a   : > { %556 = vmatpush.msrb.mxu3 %v272_v38 }
  0x3c   : > { %1507 = vmatmul.msk.f32.gmra.mxu0 %vm325_vm0, %v299_v39 }
  0x3d   : > { %1511 = vmatmul.msk.f32.gmra.mxu1 %vm325_vm0, %v299_v39  ;;  %1515 = vmatmul.msk.f32.gmra.mxu2 %vm325_vm0, %v299_v39 }
  0x3e   : > { %1519 = vmatmul.msk.f32.gmra.mxu3 %vm325_vm0, %v299_v39  ;;  %619 = vperm.xlu0 %1697, %v1542_v40  }
  0x3f   : > { %614 = vperm.xlu1 %1698, %v1541_v41   ;;  %v2088_v41 = vld [vmem:[%s2429_s1 + $0x28] sm:$0xff] }
  0x44   : > { %1508 = vmatmul.msk.f32.gmra.mxu0 %vm325_vm0, %v300_v42 }
  0x45   : > { %1512 = vmatmul.msk.f32.gmra.mxu1 %vm325_vm0, %v300_v42  ;;  %1516 = vmatmul.msk.f32.gmra.mxu2 %vm325_vm0, %v300_v42 }
  0x46   : > { %1520 = vmatmul.msk.f32.gmra.mxu3 %vm325_vm0, %v300_v42  ;;  %930 = vperm.xlu0 %1697, %v1583_v43  }
  0x47   : > { %925 = vperm.xlu1 %1698, %v1582_v44   ;;  %v1544_v44 = vld [vmem:[%s2430_s2 + $0x38] sm:$0xff] }
  0x48   : > { %629 = vperm.xlu2 %1699, %v1544_v44  }
  0x4c   : > { %1521 = vmatmul.msk.f32.vlgmr.msrb.gmra.mxu0 %vm325_vm0, %v1950_v17 }
  0x4d   : > { %1525 = vmatmul.msk.f32.vlgmr.msrb.gmra.mxu1 %vm325_vm0, %v1950_v17  ;;  %1529 = vmatmul.msk.f32.vlgmr.msrb.gmra.mxu2 %vm325_vm0, %v1950_v17 }
  0x4e   : > { %1533 = vmatmul.msk.f32.vlgmr.msrb.gmra.mxu3 %vm325_vm0, %v1950_v17  ;;  %1218 = vperm.xlu0 %1697, %v1215_v45  }
  0x54   : > { %1522 = vmatmul.msk.f32.gmra.mxu0 %vm325_vm0, %v298_v30 }
  0x55   : > { %1526 = vmatmul.msk.f32.gmra.mxu1 %vm325_vm0, %v298_v30  ;;  %1530 = vmatmul.msk.f32.gmra.mxu2 %vm325_vm0, %v298_v30 }
  0x56   : > { %1534 = vmatmul.msk.f32.gmra.mxu3 %vm325_vm0, %v298_v30 }
  0x5c   : > { %1523 = vmatmul.msk.f32.gmra.mxu0 %vm325_vm0, %v299_v39 }
  0x5d   : > { %1527 = vmatmul.msk.f32.gmra.mxu1 %vm325_vm0, %v299_v39  ;;  %1531 = vmatmul.msk.f32.gmra.mxu2 %vm325_vm0, %v299_v39 }
  0x5e   : > { %1535 = vmatmul.msk.f32.gmra.mxu3 %vm325_vm0, %v299_v39 }
  0x64   : > { %1524 = vmatmul.msk.f32.gmra.mxu0 %vm325_vm0, %v300_v42 }
  0x65   : > { %1528 = vmatmul.msk.f32.gmra.mxu1 %vm325_vm0, %v300_v42  ;;  %1532 = vmatmul.msk.f32.gmra.mxu2 %vm325_vm0, %v300_v42 }
  0x66   : > { %1536 = vmatmul.msk.f32.gmra.mxu3 %vm325_vm0, %v300_v42 }
  0xa0   : > { %v2044_v52 = vpop.permute.xlu0 %322 }
  0xa1   : > { %v2046_v57 = vpop.permute.xlu1 %312 }
  0xa8   : > { %v2048_v60 = vpop.permute.xlu0 %317 }
  0xa9   : > { %v355_v46 = vpop.f32.mrf.mxu0  ;;  %v2056_v6 = vpop.permute.xlu1 %307 }
  0xaa   : > { %v384_v47 = vpop.f32.mrf.mxu1  ;;  %v356_v10 = vadd.f32 %v355_v46, %v2056_v6 }
  0xab   : > { %v385_v13 = vadd.f32 %v384_v47, %v2056_v6  ;;  %v2104_v47 = vld [vmem:[%s2429_s1 + $0x30] sm:$0xff] }
  0xac   : > { %v570_v22 = vmax.f32 %v356_v10, 0.0 }
  0xad   : > { %v571_v26 = vmax.f32 %v385_v13, 0.0 }
  0xb0   : > { %v413_v48 = vpop.f32.mrf.mxu2 }
  0xb1   : > { %v442_v49 = vpop.f32.mrf.mxu3  ;;  %v358_v50 = vpop.f32.mrf.mxu0  ;;  %v414_v29 = vadd.f32 %v413_v48, %v2056_v6 }
  0xb2   : > { %v387_v51 = vpop.f32.mrf.mxu1  ;;  %v359_v62 = vadd.f32 %v358_v50, %v2046_v57  ;;  %v443_v31 = vadd.f32 %v442_v49, %v2056_v6  ;;  %v1543_v50 = vld [vmem:[%s2430_s2 + $0x30] sm:$0xff] }
  0xb3   : > { %v388_v2 = vadd.f32 %v387_v51, %v2046_v57  ;;  %v572_v37 = vmax.f32 %v414_v29, 0.0  ;;  %624 = vperm.xlu2 %1699, %v1543_v50  }
  0xb4   : > { %v578_v8 = vmax.f32 %v359_v62, 0.0  ;;  %v573_v39 = vmax.f32 %v443_v31, 0.0 }
  0xb5   : > { %v579_v11 = vmax.f32 %v388_v2, 0.0 }
  0xb8   : > { %v416_v53 = vpop.f32.mrf.mxu2 }
  0xb9   : > { %v445_v54 = vpop.f32.mrf.mxu3  ;;  %v361_v55 = vpop.f32.mrf.mxu0  ;;  %v417_v23 = vadd.f32 %v416_v53, %v2046_v57 }
  0xba   : > { %v390_v56 = vpop.f32.mrf.mxu1  ;;  %v362_v63 = vadd.f32 %v361_v55, %v2048_v60  ;;  %v446_v28 = vadd.f32 %v445_v54, %v2046_v57 }
  0xbb   : > { %v391_v3 = vadd.f32 %v390_v56, %v2048_v60  ;;  %v580_v33 = vmax.f32 %v417_v23, 0.0 }
  0xbc   : > { %v586_v9 = vmax.f32 %v362_v63, 0.0  ;;  %v581_v34 = vmax.f32 %v446_v28, 0.0 }
  0xbd   : > { %v587_v12 = vmax.f32 %v391_v3, 0.0 }
  0xc0   : > { %v419_v58 = vpop.f32.mrf.mxu2 }
  0xc1   : > { %v448_v59 = vpop.f32.mrf.mxu3  ;;  %v364_v61 = vpop.f32.mrf.mxu0  ;;  %v420_v16 = vadd.f32 %v419_v58, %v2048_v60  ;;  %v2123_v58 = vld [vmem:[%s2429_s1 + $0x38] sm:$0xff] }
  0xc2   : > { %v365_v0 = vadd.f32 %v364_v61, %v2044_v52  ;;  %v393_v1 = vpop.f32.mrf.mxu1  ;;  %v449_v20 = vadd.f32 %v448_v59, %v2048_v60 }
  0xc3   : > { %v394_v4 = vadd.f32 %v393_v1, %v2044_v52  ;;  %v588_v30 = vmax.f32 %v420_v16, 0.0 }
  0xc4   : > { %v594_v5 = vmax.f32 %v365_v0, 0.0  ;;  %v589_v32 = vmax.f32 %v449_v20, 0.0 }
  0xc5   : > { %v595_v7 = vmax.f32 %v394_v4, 0.0 }
  0xc6   : > { %656 = vmatpush.msra.mxu0 %v594_v5 }
  0xc7   : > { %685 = vmatpush.msra.mxu1 %v595_v7 }
  0xc8   : > { %v422_v14 = vpop.f32.mrf.mxu2  ;;  %657 = vmatpush.msra.mxu0 %v586_v9 }
  0xc9   : > { %v451_v15 = vpop.f32.mrf.mxu3  ;;  %v423_v17 = vadd.f32 %v422_v14, %v2044_v52  ;;  %686 = vmatpush.msra.mxu1 %v587_v12  ;;  %v2063_v19 = vpop.f32.mrf.mxu0 }
  0xca   : > { %v452_v18 = vadd.f32 %v451_v15, %v2044_v52  ;;  %v2066_v21 = vpop.f32.mrf.mxu1  ;;  %658 = vmatpush.msra.mxu0 %v578_v8  ;;  %v472_v1 = vadd.f32 %v2063_v19, %v2056_v6  ;;  %v1584_v8 = vld [vmem:[%s2430_s2 + $0x58] sm:$0xff] }
  0xcb   : > { %v596_v24 = vmax.f32 %v423_v17, 0.0  ;;  %687 = vmatpush.msra.mxu1 %v579_v11  ;;  %v501_v3 = vadd.f32 %v2066_v21, %v2056_v6  ;;  %935 = vperm.xlu2 %1699, %v1584_v8   ;;  %v1581_v21 = vld [vmem:[%s2430_s2 + $0x40] sm:$0xff] }
  0xcc   : > { %v597_v25 = vmax.f32 %v452_v18, 0.0  ;;  %659 = vmatpush.msra.mxu0 %v570_v22  ;;  %v574_v14 = vmax.f32 %v472_v1, 0.0 }
  0xcd   : > { %688 = vmatpush.msra.mxu1 %v571_v26  ;;  %714 = vmatpush.msra.mxu2 %v596_v24  ;;  %v575_v18 = vmax.f32 %v501_v3, 0.0 }
  0xce   : > { %743 = vmatpush.msra.mxu3 %v597_v25  ;;  %1545 = vmatmul.msk.f32.vlgmr.msra.gmra.mxu0 %vm325_vm0, %v2072_v27 }
  0xcf   : > { %1549 = vmatmul.msk.f32.vlgmr.msra.gmra.mxu1 %vm325_vm0, %v2072_v27  ;;  %715 = vmatpush.msra.mxu2 %v588_v30  ;;  %v2192_v30 = vpop.permute.xlu2 %629 }
  0xd0   : > { %744 = vmatpush.msra.mxu3 %v589_v32  ;;  %v2081_v35 = vpop.f32.mrf.mxu2 }
  0xd1   : > { %v2083_v36 = vpop.f32.mrf.mxu3  ;;  %716 = vmatpush.msra.mxu2 %v580_v33  ;;  %v474_v38 = vpop.f32.mrf.mxu0  ;;  %v530_v20 = vadd.f32 %v2081_v35, %v2056_v6 }
  0xd2   : > { %745 = vmatpush.msra.mxu3 %v581_v34  ;;  %v503_v40 = vpop.f32.mrf.mxu1  ;;  %v475_v62 = vadd.f32 %v474_v38, %v2046_v57  ;;  %v559_v22 = vadd.f32 %v2083_v36, %v2056_v6 }
  0xd3   : > { %717 = vmatpush.msra.mxu2 %v572_v37  ;;  %v504_v0 = vadd.f32 %v503_v40, %v2046_v57  ;;  %920 = vperm.xlu2 %1699, %v1581_v21   ;;  %v576_v25 = vmax.f32 %v530_v20, 0.0 }
  0xd4   : > { %746 = vmatpush.msra.mxu3 %v573_v39  ;;  %1553 = vmatmul.msk.f32.vlgmr.msra.gmra.mxu2 %vm325_vm0, %v2072_v27  ;;  %v582_v9 = vmax.f32 %v475_v62, 0.0  ;;  %v577_v26 = vmax.f32 %v559_v22, 0.0 }
  0xd5   : > { %1557 = vmatmul.msk.f32.vlgmr.msra.gmra.mxu3 %vm325_vm0, %v2072_v27  ;;  %v583_v12 = vmax.f32 %v504_v0, 0.0 }
  0xd6   : > { %1546 = vmatmul.msk.f32.gmra.mxu0 %vm325_vm0, %v2088_v41 }
  0xd7   : > { %1550 = vmatmul.msk.f32.gmra.mxu1 %vm325_vm0, %v2088_v41 }
  0xd8   : > { %v532_v42 = vpop.f32.mrf.mxu2 }
  0xd9   : > { %v561_v43 = vpop.f32.mrf.mxu3  ;;  %v477_v45 = vpop.f32.mrf.mxu0  ;;  %v533_v19 = vadd.f32 %v532_v42, %v2046_v57 }
  0xda   : > { %v506_v46 = vpop.f32.mrf.mxu1  ;;  %v478_v55 = vadd.f32 %v477_v45, %v2048_v60 }
  0xdb   : > { %v507_v59 = vadd.f32 %v506_v46, %v2048_v60 }
  0xdc   : > { %1554 = vmatmul.msk.f32.gmra.mxu2 %vm325_vm0, %v2088_v41  ;;  %v590_v2 = vmax.f32 %v478_v55, 0.0 }
  0xdd   : > { %1558 = vmatmul.msk.f32.gmra.mxu3 %vm325_vm0, %v2088_v41  ;;  %v591_v4 = vmax.f32 %v507_v59, 0.0 }
  0xde   : > { %1547 = vmatmul.msk.f32.gmra.mxu0 %vm325_vm0, %v2104_v47 }
  0xdf   : > { %1551 = vmatmul.msk.f32.gmra.mxu1 %vm325_vm0, %v2104_v47 }
  0xe0   : > { %v535_v48 = vpop.f32.mrf.mxu2 }
  0xe1   : > { %v564_v49 = vpop.f32.mrf.mxu3  ;;  %v480_v51 = vpop.f32.mrf.mxu0  ;;  %v536_v13 = vadd.f32 %v535_v48, %v2048_v60 }
  0xe2   : > { %v481_v53 = vadd.f32 %v480_v51, %v2044_v52  ;;  %v509_v54 = vpop.f32.mrf.mxu1  ;;  %v565_v15 = vadd.f32 %v564_v49, %v2048_v60  ;;  %v2203_v48 = vpop.permute.xlu1 %614 }
  0xe3   : > { %v510_v56 = vadd.f32 %v509_v54, %v2044_v52  ;;  %v592_v60 = vmax.f32 %v536_v13, 0.0 }
  0xe4   : > { %v598_v61 = vmax.f32 %v481_v53, 0.0  ;;  %1555 = vmatmul.msk.f32.gmra.mxu2 %vm325_vm0, %v2104_v47  ;;  %v593_v23 = vmax.f32 %v565_v15, 0.0 }
  0xe5   : > { %v599_v63 = vmax.f32 %v510_v56, 0.0  ;;  %1559 = vmatmul.msk.f32.gmra.mxu3 %vm325_vm0, %v2104_v47 }
  0xe6   : > { %1548 = vmatmul.msk.f32.gmra.mxu0 %vm325_vm0, %v2123_v58 }
  0xe7   : > { %1552 = vmatmul.msk.f32.gmra.mxu1 %vm325_vm0, %v2123_v58  ;;  %772 = vmatpush.msrb.mxu0 %v598_v61 }
  0xe8   : > { %801 = vmatpush.msrb.mxu1 %v599_v63  ;;  %v538_v5 = vpop.f32.mrf.mxu2  ;;  %v2213_v63 = vld [vmem:[%s2429_s1 + $0x40] sm:$0xff] }
  0xe9   : > { %v567_v7 = vpop.f32.mrf.mxu3  ;;  %v539_v10 = vadd.f32 %v538_v5, %v2044_v52  ;;  %773 = vmatpush.msrb.mxu0 %v590_v2 }
  0xea   : > { %v568_v11 = vadd.f32 %v567_v7, %v2044_v52  ;;  %802 = vmatpush.msrb.mxu1 %v591_v4  ;;  %v562_v52 = vadd.f32 %v561_v43, %v2046_v57  ;;  %v584_v57 = vmax.f32 %v533_v19, 0.0  ;;  %v2199_v43 = vpop.permute.xlu0 %619 }
  0xeb   : > { %v600_v16 = vmax.f32 %v539_v10, 0.0  ;;  %774 = vmatpush.msrb.mxu0 %v582_v9 }
  0xec   : > { %v601_v17 = vmax.f32 %v568_v11, 0.0  ;;  %803 = vmatpush.msrb.mxu1 %v583_v12  ;;  %1556 = vmatmul.msk.f32.gmra.mxu2 %vm325_vm0, %v2123_v58  ;;  %v585_v24 = vmax.f32 %v562_v52, 0.0 }
  0xed   : > { %1560 = vmatmul.msk.f32.gmra.mxu3 %vm325_vm0, %v2123_v58  ;;  %775 = vmatpush.msrb.mxu0 %v574_v14 }
  0xee   : > { %804 = vmatpush.msrb.mxu1 %v575_v18  ;;  %830 = vmatpush.msrb.mxu2 %v600_v16  ;;  %v2231_v16 = vld [vmem:[%s2429_s1 + $0x48] sm:$0xff] }
  0xef   : > { %859 = vmatpush.msrb.mxu3 %v601_v17  ;;  %1561 = vmatmul.msk.f32.vlgmr.msrb.gmra.mxu0 %vm325_vm0, %v2072_v27 }
  0xf0   : > { %1565 = vmatmul.msk.f32.vlgmr.msrb.gmra.mxu1 %vm325_vm0, %v2072_v27  ;;  %831 = vmatpush.msrb.mxu2 %v592_v60 }
  0xf1   : > { %860 = vmatpush.msrb.mxu3 %v593_v23 }
  0xf2   : > { %832 = vmatpush.msrb.mxu2 %v584_v57 }
  0xf3   : > { %861 = vmatpush.msrb.mxu3 %v585_v24  ;;  %v2249_v24 = vld [vmem:[%s2429_s1 + $0x50] sm:$0xff] }
  0xf4   : > { %833 = vmatpush.msrb.mxu2 %v576_v25 }
  0xf5   : > { %862 = vmatpush.msrb.mxu3 %v577_v26  ;;  %1569 = vmatmul.msk.f32.vlgmr.msrb.gmra.mxu2 %vm325_vm0, %v2072_v27 }
  0xf6   : > { %1573 = vmatmul.msk.f32.vlgmr.msrb.gmra.mxu3 %vm325_vm0, %v2072_v27 }
  0xf7   : > { %1562 = vmatmul.msk.f32.gmra.mxu0 %vm325_vm0, %v2088_v41 }
  0xf8   : > { %1566 = vmatmul.msk.f32.gmra.mxu1 %vm325_vm0, %v2088_v41 }
  0xfd   : > { %1570 = vmatmul.msk.f32.gmra.mxu2 %vm325_vm0, %v2088_v41 }
  0xfe   : > { %1574 = vmatmul.msk.f32.gmra.mxu3 %vm325_vm0, %v2088_v41 }
  0xff   : > { %1563 = vmatmul.msk.f32.gmra.mxu0 %vm325_vm0, %v2104_v47 }
 0x100   : > { %1567 = vmatmul.msk.f32.gmra.mxu1 %vm325_vm0, %v2104_v47 }
 0x105   : > { %1571 = vmatmul.msk.f32.gmra.mxu2 %vm325_vm0, %v2104_v47 }
 0x106   : > { %1575 = vmatmul.msk.f32.gmra.mxu3 %vm325_vm0, %v2104_v47 }
 0x107   : > { %1564 = vmatmul.msk.f32.gmra.mxu0 %vm325_vm0, %v2123_v58 }
 0x108   : > { %1568 = vmatmul.msk.f32.gmra.mxu1 %vm325_vm0, %v2123_v58 }
 0x10d   : > { %1572 = vmatmul.msk.f32.gmra.mxu2 %vm325_vm0, %v2123_v58  ;;  %v2194_v37 = vpop.permute.xlu2 %624 }
 0x10e   : > { %1576 = vmatmul.msk.f32.gmra.mxu3 %vm325_vm0, %v2123_v58 }
 0x14b   : > { %v661_v6 = vpop.f32.mrf.mxu0 }
 0x14c   : > { %v690_v27 = vpop.f32.mrf.mxu1  ;;  %v662_v54 = vadd.f32 %v661_v6, %v2203_v48 }
 0x14d   : > { %v691_v56 = vadd.f32 %v690_v27, %v2203_v48 }
 0x14e   : > { %v876_v61 = vmax.f32 %v662_v54, 0.0 }
 0x14f   : > { %v877_v0 = vmax.f32 %v691_v56, 0.0 }
 0x153   : > { %v664_v28 = vpop.f32.mrf.mxu0 }
 0x154   : > { %v693_v29 = vpop.f32.mrf.mxu1  ;;  %v665_v45 = vadd.f32 %v664_v28, %v2199_v43  ;;  %v2262_v28 = vld [vmem:[%s2429_s1 + $0x58] sm:$0xff] }
 0x155   : > { %v694_v49 = vadd.f32 %v693_v29, %v2199_v43 }
 0x156   : > { %v884_v58 = vmax.f32 %v665_v45, 0.0 }
 0x157   : > { %v719_v31 = vpop.f32.mrf.mxu2  ;;  %v885_v59 = vmax.f32 %v694_v49, 0.0 }
 0x158   : > { %v748_v32 = vpop.f32.mrf.mxu3  ;;  %v720_v13 = vadd.f32 %v719_v31, %v2203_v48 }
 0x159   : > { %v749_v17 = vadd.f32 %v748_v32, %v2203_v48 }
 0x15a   : > { %v878_v60 = vmax.f32 %v720_v13, 0.0 }
 0x15b   : > { %v667_v33 = vpop.f32.mrf.mxu0  ;;  %v879_v22 = vmax.f32 %v749_v17, 0.0 }
 0x15c   : > { %v696_v34 = vpop.f32.mrf.mxu1  ;;  %v668_v38 = vadd.f32 %v667_v33, %v2194_v37 }
 0x15d   : > { %v697_v40 = vadd.f32 %v696_v34, %v2194_v37 }
 0x15e   : > { %v892_v47 = vmax.f32 %v668_v38, 0.0 }
 0x15f   : > { %v722_v35 = vpop.f32.mrf.mxu2  ;;  %v893_v53 = vmax.f32 %v697_v40, 0.0 }
 0x160   : > { %v751_v36 = vpop.f32.mrf.mxu3  ;;  %v723_v9 = vadd.f32 %v722_v35, %v2199_v43 }
 0x161   : > { %v752_v11 = vadd.f32 %v751_v36, %v2199_v43 }
 0x162   : > { %v886_v52 = vmax.f32 %v723_v9, 0.0 }
 0x163   : > { %v670_v39 = vpop.f32.mrf.mxu0  ;;  %v887_v20 = vmax.f32 %v752_v11, 0.0 }
 0x164   : > { %v671_v41 = vadd.f32 %v670_v39, %v2192_v30  ;;  %v699_v42 = vpop.f32.mrf.mxu1 }
 0x165   : > { %v700_v44 = vadd.f32 %v699_v42, %v2192_v30 }
 0x166   : > { %v900_v46 = vmax.f32 %v671_v41, 0.0 }
 0x167   : > { %v901_v50 = vmax.f32 %v700_v44, 0.0  ;;  %v725_v51 = vpop.f32.mrf.mxu2 }
 0x168   : > { %v754_v55 = vpop.f32.mrf.mxu3  ;;  %962 = vmatpush.msra.mxu0 %v900_v46  ;;  %v726_v3 = vadd.f32 %v725_v51, %v2194_v37 }
 0x169   : > { %991 = vmatpush.msra.mxu1 %v901_v50  ;;  %v755_v7 = vadd.f32 %v754_v55, %v2194_v37 }
 0x16a   : > { %963 = vmatpush.msra.mxu0 %v892_v47  ;;  %v894_v14 = vmax.f32 %v726_v3, 0.0 }
 0x16b   : > { %992 = vmatpush.msra.mxu1 %v893_v53  ;;  %v895_v18 = vmax.f32 %v755_v7, 0.0 }
 0x16c   : > { %v2208_v62 = vpop.f32.mrf.mxu0  ;;  %964 = vmatpush.msra.mxu0 %v884_v58 }
 0x16d   : > { %v2215_v1 = vpop.f32.mrf.mxu1  ;;  %993 = vmatpush.msra.mxu1 %v885_v59  ;;  %v778_v41 = vadd.f32 %v2208_v62, %v2203_v48 }
 0x16e   : > { %965 = vmatpush.msra.mxu0 %v876_v61  ;;  %v807_v45 = vadd.f32 %v2215_v1, %v2203_v48 }
 0x16f   : > { %994 = vmatpush.msra.mxu1 %v877_v0  ;;  %v728_v2 = vpop.f32.mrf.mxu2  ;;  %1585 = vmatmul.msk.f32.vlgmr.msra.gmra.mxu0 %vm325_vm0, %v2213_v63  ;;  %v880_v50 = vmax.f32 %v778_v41, 0.0 }
 0x170   : > { %v729_v4 = vadd.f32 %v728_v2, %v2192_v30  ;;  %v757_v5 = vpop.f32.mrf.mxu3  ;;  %1589 = vmatmul.msk.f32.vlgmr.msra.gmra.mxu1 %vm325_vm0, %v2213_v63  ;;  %v881_v51 = vmax.f32 %v807_v45, 0.0 }
 0x171   : > { %v758_v8 = vadd.f32 %v757_v5, %v2192_v30 }
 0x172   : > { %v902_v10 = vmax.f32 %v729_v4, 0.0 }
 0x173   : > { %v903_v12 = vmax.f32 %v758_v8, 0.0 }
 0x174   : > { %v780_v15 = vpop.f32.mrf.mxu0  ;;  %1020 = vmatpush.msra.mxu2 %v902_v10 }
 0x175   : > { %v809_v19 = vpop.f32.mrf.mxu1  ;;  %1049 = vmatpush.msra.mxu3 %v903_v12  ;;  %v781_v35 = vadd.f32 %v780_v15, %v2199_v43  ;;  %v2328_v12 = vpop.permute.xlu2 %935 }
 0x176   : > { %1021 = vmatpush.msra.mxu2 %v894_v14  ;;  %v810_v38 = vadd.f32 %v809_v19, %v2199_v43  ;;  %v2330_v15 = vpop.permute.xlu0 %930 }
 0x177   : > { %1050 = vmatpush.msra.mxu3 %v895_v18  ;;  %1586 = vmatmul.msk.f32.gmra.mxu0 %vm325_vm0, %v2231_v16  ;;  %v888_v47 = vmax.f32 %v781_v35, 0.0  ;;  %v2347_v35 = vld [vmem:[%s2431_s3] sm:$0xff] }
 0x178   : > { %v2236_v21 = vpop.f32.mrf.mxu2  ;;  %1590 = vmatmul.msk.f32.gmra.mxu1 %vm325_vm0, %v2231_v16  ;;  %1022 = vmatpush.msra.mxu2 %v886_v52  ;;  %v889_v49 = vmax.f32 %v810_v38, 0.0  ;;  %v2334_v52 = vpop.permute.xlu1 %925 }
 0x179   : > { %v2240_v23 = vpop.f32.mrf.mxu3  ;;  %1051 = vmatpush.msra.mxu3 %v887_v20  ;;  %v836_v2 = vadd.f32 %v2236_v21, %v2203_v48 }
 0x17a   : > { %1023 = vmatpush.msra.mxu2 %v878_v60 }
 0x17b   : > { %1052 = vmatpush.msra.mxu3 %v879_v22  ;;  %1593 = vmatmul.msk.f32.vlgmr.msra.gmra.mxu2 %vm325_vm0, %v2213_v63 }
 0x17c   : > { %v783_v57 = vpop.f32.mrf.mxu0  ;;  %1597 = vmatmul.msk.f32.vlgmr.msra.gmra.mxu3 %vm325_vm0, %v2213_v63 }
 0x17d   : > { %v812_v25 = vpop.f32.mrf.mxu1  ;;  %v784_v29 = vadd.f32 %v783_v57, %v2194_v37 }
 0x17e   : > { %v813_v33 = vadd.f32 %v812_v25, %v2194_v37 }
 0x17f   : > { %1587 = vmatmul.msk.f32.gmra.mxu0 %vm325_vm0, %v2249_v24  ;;  %v896_v42 = vmax.f32 %v784_v29, 0.0 }
 0x180   : > { %v838_v26 = vpop.f32.mrf.mxu2  ;;  %1591 = vmatmul.msk.f32.gmra.mxu1 %vm325_vm0, %v2249_v24  ;;  %v897_v46 = vmax.f32 %v813_v33, 0.0 }
 0x181   : > { %v867_v6 = vpop.f32.mrf.mxu3  ;;  %v839_v61 = vadd.f32 %v838_v26, %v2199_v43 }
 0x182   : > { %v868_v0 = vadd.f32 %v867_v6, %v2199_v43  ;;  %v882_v43 = vmax.f32 %v836_v2, 0.0 }
 0x183   : > { %1594 = vmatmul.msk.f32.gmra.mxu2 %vm325_vm0, %v2231_v16  ;;  %v890_v4 = vmax.f32 %v839_v61, 0.0 }
 0x184   : > { %v786_v27 = vpop.f32.mrf.mxu0  ;;  %1598 = vmatmul.msk.f32.gmra.mxu3 %vm325_vm0, %v2231_v16  ;;  %v891_v5 = vmax.f32 %v868_v0, 0.0 }
 0x185   : > { %v787_v31 = vadd.f32 %v786_v27, %v2192_v30  ;;  %v815_v32 = vpop.f32.mrf.mxu1 }
 0x186   : > { %v816_v34 = vadd.f32 %v815_v32, %v2192_v30 }
 0x187   : > { %v904_v36 = vmax.f32 %v787_v31, 0.0  ;;  %1588 = vmatmul.msk.f32.gmra.mxu0 %vm325_vm0, %v2262_v28 }
 0x188   : > { %v905_v39 = vmax.f32 %v816_v34, 0.0  ;;  %v841_v40 = vpop.f32.mrf.mxu2  ;;  %1592 = vmatmul.msk.f32.gmra.mxu1 %vm325_vm0, %v2262_v28 }
 0x189   : > { %v870_v44 = vpop.f32.mrf.mxu3  ;;  %1078 = vmatpush.msrb.mxu0 %v904_v36  ;;  %v842_v54 = vadd.f32 %v841_v40, %v2194_v37 }
 0x18a   : > { %1107 = vmatpush.msrb.mxu1 %v905_v39  ;;  %v871_v58 = vadd.f32 %v870_v44, %v2194_v37 }
 0x18b   : > { %1079 = vmatpush.msrb.mxu0 %v896_v42  ;;  %1595 = vmatmul.msk.f32.gmra.mxu2 %vm325_vm0, %v2249_v24  ;;  %v898_v3 = vmax.f32 %v842_v54, 0.0 }
 0x18c   : > { %1108 = vmatpush.msrb.mxu1 %v897_v46  ;;  %1599 = vmatmul.msk.f32.gmra.mxu3 %vm325_vm0, %v2249_v24  ;;  %v899_v37 = vmax.f32 %v871_v58, 0.0 }
 0x18d   : > { %1080 = vmatpush.msrb.mxu0 %v888_v47 }
 0x18e   : > { %1109 = vmatpush.msrb.mxu1 %v889_v49 }
 0x18f   : > { %1081 = vmatpush.msrb.mxu0 %v880_v50 }
 0x190   : > { %1110 = vmatpush.msrb.mxu1 %v881_v51  ;;  %v844_v53 = vpop.f32.mrf.mxu2  ;;  %1601 = vmatmul.msk.f32.vlgmr.msrb.gmra.mxu0 %vm325_vm0, %v2213_v63 }
 0x191   : > { %v845_v55 = vadd.f32 %v844_v53, %v2192_v30  ;;  %v873_v56 = vpop.f32.mrf.mxu3  ;;  %1605 = vmatmul.msk.f32.vlgmr.msrb.gmra.mxu1 %vm325_vm0, %v2213_v63 }
 0x192   : > { %v874_v59 = vadd.f32 %v873_v56, %v2192_v30  ;;  %v865_v30 = vadd.f32 %v2240_v23, %v2203_v48 }
 0x193   : > { %v906_v62 = vmax.f32 %v845_v55, 0.0  ;;  %1596 = vmatmul.msk.f32.gmra.mxu2 %vm325_vm0, %v2262_v28 }
 0x194   : > { %v907_v1 = vmax.f32 %v874_v59, 0.0  ;;  %1600 = vmatmul.msk.f32.gmra.mxu3 %vm325_vm0, %v2262_v28  ;;  %v883_v7 = vmax.f32 %v865_v30, 0.0 }
 0x195   : > { %1136 = vmatpush.msrb.mxu2 %v906_v62 }
 0x196   : > { %1165 = vmatpush.msrb.mxu3 %v907_v1 }
 0x197   : > { %1137 = vmatpush.msrb.mxu2 %v898_v3 }
 0x198   : > { %1166 = vmatpush.msrb.mxu3 %v899_v37  ;;  %1602 = vmatmul.msk.f32.gmra.mxu0 %vm325_vm0, %v2231_v16 }
 0x199   : > { %1606 = vmatmul.msk.f32.gmra.mxu1 %vm325_vm0, %v2231_v16  ;;  %1138 = vmatpush.msrb.mxu2 %v890_v4 }
 0x19a   : > { %1167 = vmatpush.msrb.mxu3 %v891_v5 }
 0x19b   : > { %1139 = vmatpush.msrb.mxu2 %v882_v43 }
 0x19c   : > { %1168 = vmatpush.msrb.mxu3 %v883_v7  ;;  %1609 = vmatmul.msk.f32.vlgmr.msrb.gmra.mxu2 %vm325_vm0, %v2213_v63 }
 0x19d   : > { %1613 = vmatmul.msk.f32.vlgmr.msrb.gmra.mxu3 %vm325_vm0, %v2213_v63 }
 0x1a0   : > { %1603 = vmatmul.msk.f32.gmra.mxu0 %vm325_vm0, %v2249_v24 }
 0x1a1   : > { %1607 = vmatmul.msk.f32.gmra.mxu1 %vm325_vm0, %v2249_v24 }
 0x1a4   : > { %1610 = vmatmul.msk.f32.gmra.mxu2 %vm325_vm0, %v2231_v16 }
 0x1a5   : > { %1614 = vmatmul.msk.f32.gmra.mxu3 %vm325_vm0, %v2231_v16 }
 0x1a8   : > { %1604 = vmatmul.msk.f32.gmra.mxu0 %vm325_vm0, %v2262_v28 }
 0x1a9   : > { %1608 = vmatmul.msk.f32.gmra.mxu1 %vm325_vm0, %v2262_v28 }
 0x1ac   : > { %1611 = vmatmul.msk.f32.gmra.mxu2 %vm325_vm0, %v2249_v24 }
 0x1ad   : > { %1615 = vmatmul.msk.f32.gmra.mxu3 %vm325_vm0, %v2249_v24  ;;  %v2339_v24 = vpop.permute.xlu2 %920 }
 0x1b4   : > { %1612 = vmatmul.msk.f32.gmra.mxu2 %vm325_vm0, %v2262_v28 }
 0x1b5   : > { %1616 = vmatmul.msk.f32.gmra.mxu3 %vm325_vm0, %v2262_v28 }
 0x1ec   : > { %v967_v48 = vpop.f32.mrf.mxu0 }
 0x1ed   : > { %v996_v63 = vpop.f32.mrf.mxu1  ;;  %v968_v6 = vadd.f32 %v967_v48, %v2339_v24 }
 0x1ee   : > { %v997_v28 = vadd.f32 %v996_v63, %v2339_v24 }
 0x1ef   : > { %v1182_v33 = vmax.f32 %v968_v6, 0.0 }
 0x1f0   : > { %v1183_v36 = vmax.f32 %v997_v28, 0.0 }
 0x1f4   : > { %v970_v8 = vpop.f32.mrf.mxu0 }
 0x1f5   : > { %v999_v9 = vpop.f32.mrf.mxu1  ;;  %v971_v22 = vadd.f32 %v970_v8, %v2334_v52 }
 0x1f6   : > { %v1000_v25 = vadd.f32 %v999_v9, %v2334_v52 }
 0x1f7   : > { %v1190_v31 = vmax.f32 %v971_v22, 0.0 }
 0x1f8   : > { %v1191_v32 = vmax.f32 %v1000_v25, 0.0 }
 0x1fc   : > { %v973_v10 = vpop.f32.mrf.mxu0 }
 0x1fd   : > { %v1002_v11 = vpop.f32.mrf.mxu1  ;;  %v974_v17 = vadd.f32 %v973_v10, %v2330_v15 }
 0x1fe   : > { %v1025_v13 = vpop.f32.mrf.mxu2  ;;  %v1003_v20 = vadd.f32 %v1002_v11, %v2330_v15 }
 0x1ff   : > { %v1054_v14 = vpop.f32.mrf.mxu3  ;;  %v1198_v27 = vmax.f32 %v974_v17, 0.0  ;;  %v1026_v56 = vadd.f32 %v1025_v13, %v2339_v24 }
 0x200   : > { %v1199_v29 = vmax.f32 %v1003_v20, 0.0  ;;  %v1055_v59 = vadd.f32 %v1054_v14, %v2339_v24 }
 0x201   : > { %v1184_v3 = vmax.f32 %v1026_v56, 0.0 }
 0x202   : > { %v1185_v37 = vmax.f32 %v1055_v59, 0.0 }
 0x204   : > { %v976_v16 = vpop.f32.mrf.mxu0 }
 0x205   : > { %v977_v18 = vadd.f32 %v976_v16, %v2328_v12  ;;  %v1005_v19 = vpop.f32.mrf.mxu1 }
 0x206   : > { %v1006_v60 = vadd.f32 %v1005_v19, %v2328_v12  ;;  %v1028_v21 = vpop.f32.mrf.mxu2 }
 0x207   : > { %v1206_v23 = vmax.f32 %v977_v18, 0.0  ;;  %v1057_v57 = vpop.f32.mrf.mxu3  ;;  %v1029_v51 = vadd.f32 %v1028_v21, %v2334_v52 }
 0x208   : > { %v1207_v26 = vmax.f32 %v1006_v60, 0.0  ;;  %v1058_v54 = vadd.f32 %v1057_v57, %v2334_v52 }
 0x209   : > { %1236 = vmatpush.msra.mxu0 %v1206_v23  ;;  %v1192_v62 = vmax.f32 %v1029_v51, 0.0 }
 0x20a   : > { %1256 = vmatpush.msra.mxu1 %v1207_v26  ;;  %v1193_v1 = vmax.f32 %v1058_v54, 0.0 }
 0x20b   : > { %1237 = vmatpush.msra.mxu0 %v1198_v27 }
 0x20c   : > { %1257 = vmatpush.msra.mxu1 %v1199_v29 }
 0x20d   : > { %v1083_v34 = vpop.f32.mrf.mxu0  ;;  %1238 = vmatpush.msra.mxu0 %v1190_v31 }
 0x20e   : > { %v1112_v38 = vpop.f32.mrf.mxu1  ;;  %1258 = vmatpush.msra.mxu1 %v1191_v32  ;;  %v1031_v39 = vpop.f32.mrf.mxu2  ;;  %v1084_v17 = vadd.f32 %v1083_v34, %v2339_v24 }
 0x20f   : > { %v1060_v40 = vpop.f32.mrf.mxu3  ;;  %1239 = vmatpush.msra.mxu0 %v1182_v33  ;;  %v1032_v45 = vadd.f32 %v1031_v39, %v2330_v15  ;;  %v1113_v19 = vadd.f32 %v1112_v38, %v2339_v24 }
 0x210   : > { %1259 = vmatpush.msra.mxu1 %v1183_v36  ;;  %1617 = vmatmul.msk.f32.vlgmr.msra.gmra.mxu0 %vm325_vm0, %v2347_v35  ;;  %v1061_v49 = vadd.f32 %v1060_v40, %v2330_v15  ;;  %v1186_v22 = vmax.f32 %v1084_v17, 0.0 }
 0x211   : > { %1618 = vmatmul.msk.f32.vlgmr.msra.gmra.mxu1 %vm325_vm0, %v2347_v35  ;;  %v1200_v58 = vmax.f32 %v1032_v45, 0.0  ;;  %v1187_v23 = vmax.f32 %v1113_v19, 0.0 }
 0x212   : > { %v1201_v61 = vmax.f32 %v1061_v49, 0.0 }
 0x215   : > { %v1086_v41 = vpop.f32.mrf.mxu0 }
 0x216   : > { %v1115_v42 = vpop.f32.mrf.mxu1  ;;  %v1034_v44 = vpop.f32.mrf.mxu2  ;;  %v1087_v10 = vadd.f32 %v1086_v41, %v2334_v52 }
 0x217   : > { %v1035_v46 = vadd.f32 %v1034_v44, %v2328_v12  ;;  %v1063_v47 = vpop.f32.mrf.mxu3  ;;  %v1116_v14 = vadd.f32 %v1115_v42, %v2334_v52 }
 0x218   : > { %v1064_v50 = vadd.f32 %v1063_v47, %v2328_v12  ;;  %v1194_v60 = vmax.f32 %v1087_v10, 0.0 }
 0x219   : > { %v1208_v53 = vmax.f32 %v1035_v46, 0.0  ;;  %v1195_v21 = vmax.f32 %v1116_v14, 0.0 }
 0x21a   : > { %v1209_v55 = vmax.f32 %v1064_v50, 0.0 }
 0x21b   : > { %1276 = vmatpush.msra.mxu2 %v1208_v53 }
 0x21c   : > { %1296 = vmatpush.msra.mxu3 %v1209_v55 }
 0x21d   : > { %v1089_v0 = vpop.f32.mrf.mxu0  ;;  %1277 = vmatpush.msra.mxu2 %v1200_v58 }
 0x21e   : > { %v1118_v2 = vpop.f32.mrf.mxu1  ;;  %1297 = vmatpush.msra.mxu3 %v1201_v61  ;;  %v1090_v43 = vadd.f32 %v1089_v0, %v2330_v15 }
 0x21f   : > { %v1141_v30 = vpop.f32.mrf.mxu2  ;;  %1278 = vmatpush.msra.mxu2 %v1192_v62  ;;  %v1119_v63 = vadd.f32 %v1118_v2, %v2330_v15 }
 0x220   : > { %v1170_v4 = vpop.f32.mrf.mxu3  ;;  %1298 = vmatpush.msra.mxu3 %v1193_v1  ;;  %v1202_v18 = vmax.f32 %v1090_v43, 0.0  ;;  %v1142_v38 = vadd.f32 %v1141_v30, %v2339_v24 }
 0x221   : > { %1279 = vmatpush.msra.mxu2 %v1184_v3  ;;  %v1203_v20 = vmax.f32 %v1119_v63, 0.0  ;;  %v1171_v40 = vadd.f32 %v1170_v4, %v2339_v24 }
 0x222   : > { %1299 = vmatpush.msra.mxu3 %v1185_v37  ;;  %1619 = vmatmul.msk.f32.vlgmr.msra.gmra.mxu2 %vm325_vm0, %v2347_v35 }
 0x223   : > { %1620 = vmatmul.msk.f32.vlgmr.msra.gmra.mxu3 %vm325_vm0, %v2347_v35  ;;  %v1189_v44 = vmax.f32 %v1171_v40, 0.0 }
 0x225   : > { %v1092_v5 = vpop.f32.mrf.mxu0 }
 0x226   : > { %v1093_v7 = vadd.f32 %v1092_v5, %v2328_v12  ;;  %v1121_v48 = vpop.f32.mrf.mxu1 }
 0x227   : > { %v1122_v8 = vadd.f32 %v1121_v48, %v2328_v12  ;;  %v1144_v9 = vpop.f32.mrf.mxu2 }
 0x228   : > { %v1210_v11 = vmax.f32 %v1093_v7, 0.0  ;;  %v1173_v13 = vpop.f32.mrf.mxu3  ;;  %v1145_v32 = vadd.f32 %v1144_v9, %v2334_v52 }
 0x229   : > { %v1211_v16 = vmax.f32 %v1122_v8, 0.0  ;;  %v1174_v34 = vadd.f32 %v1173_v13, %v2334_v52  ;;  %v1219_v52 = vpop.permute.xlu0 %1218 }
 0x22a   : > { %1316 = vmatpush.msrb.mxu0 %v1210_v11  ;;  %v1196_v42 = vmax.f32 %v1145_v32, 0.0 }
 0x22b   : > { %1336 = vmatpush.msrb.mxu1 %v1211_v16 }
 0x22c   : > { %1317 = vmatpush.msrb.mxu0 %v1202_v18 }
 0x22d   : > { %1337 = vmatpush.msrb.mxu1 %v1203_v20 }
 0x22e   : > { %1318 = vmatpush.msrb.mxu0 %v1194_v60 }
 0x22f   : > { %1338 = vmatpush.msrb.mxu1 %v1195_v21  ;;  %v1147_v57 = vpop.f32.mrf.mxu2 }
 0x230   : > { %v1176_v25 = vpop.f32.mrf.mxu3  ;;  %1319 = vmatpush.msrb.mxu0 %v1186_v22  ;;  %v1148_v6 = vadd.f32 %v1147_v57, %v2330_v15 }
 0x231   : > { %1339 = vmatpush.msrb.mxu1 %v1187_v23  ;;  %1621 = vmatmul.msk.f32.vlgmr.msrb.gmra.mxu0 %vm325_vm0, %v2347_v35  ;;  %v1177_v29 = vadd.f32 %v1176_v25, %v2330_v15  ;;  %v1197_v15 = vmax.f32 %v1174_v34, 0.0 }
 0x232   : > { %1622 = vmatmul.msk.f32.vlgmr.msrb.gmra.mxu1 %vm325_vm0, %v2347_v35  ;;  %v1204_v39 = vmax.f32 %v1148_v6, 0.0 }
 0x233   : > { %v1205_v41 = vmax.f32 %v1177_v29, 0.0 }
 0x237   : > { %v1150_v26 = vpop.f32.mrf.mxu2 }
 0x238   : > { %v1151_v27 = vadd.f32 %v1150_v26, %v2328_v12  ;;  %v1179_v28 = vpop.f32.mrf.mxu3 }
 0x239   : > { %v1180_v31 = vadd.f32 %v1179_v28, %v2328_v12  ;;  %v1188_v12 = vmax.f32 %v1142_v38, 0.0 }
 0x23a   : > { %v1212_v33 = vmax.f32 %v1151_v27, 0.0 }
 0x23b   : > { %v1213_v36 = vmax.f32 %v1180_v31, 0.0 }
 0x23c   : > { %1356 = vmatpush.msrb.mxu2 %v1212_v33 }
 0x23d   : > { %1376 = vmatpush.msrb.mxu3 %v1213_v36 }
 0x23e   : > { %1357 = vmatpush.msrb.mxu2 %v1204_v39 }
 0x23f   : > { %1377 = vmatpush.msrb.mxu3 %v1205_v41 }
 0x240   : > { %1358 = vmatpush.msrb.mxu2 %v1196_v42 }
 0x241   : > { %1378 = vmatpush.msrb.mxu3 %v1197_v15 }
 0x242   : > { %1359 = vmatpush.msrb.mxu2 %v1188_v12 }
 0x243   : > { %1379 = vmatpush.msrb.mxu3 %v1189_v44  ;;  %1623 = vmatmul.msk.f32.vlgmr.msrb.gmra.mxu2 %vm325_vm0, %v2347_v35 }
 0x244   : > { %1624 = vmatmul.msk.f32.vlgmr.msrb.gmra.mxu3 %vm325_vm0, %v2347_v35 }
 0x28d   : > { %v1241_v24 = vpop.f32.mrf.mxu0 }
 0x28e   : > { %v1242_v45 = vadd.f32 %v1241_v24, %v1219_v52  ;;  %v1261_v46 = vpop.f32.mrf.mxu1 }
 0x28f   : > { %v1262_v47 = vadd.f32 %v1261_v46, %v1219_v52 }
 0x290   : > { %1384 = vst [vmem:[%s262_s10] sm:$0xff] %v1242_v45 }
 0x291   : > { %1385 = vst [vmem:[%s262_s10 + $0x8] sm:$0xff] %v1262_v47 }
 0x2a5   : > { %v1281_v49 = vpop.f32.mrf.mxu2 }
 0x2a6   : > { %v1282_v50 = vadd.f32 %v1281_v49, %v1219_v52  ;;  %v1301_v51 = vpop.f32.mrf.mxu3 }
 0x2a7   : > { %v1302_v53 = vadd.f32 %v1301_v51, %v1219_v52 }
 0x2a8   : > { %1386 = vst [vmem:[%s262_s10 + $0x10] sm:$0xff] %v1282_v50 }
 0x2a9   : > { %1387 = vst [vmem:[%s262_s10 + $0x18] sm:$0xff] %v1302_v53 }
 0x2ae   : > { %v1321_v54 = vpop.f32.mrf.mxu0 }
 0x2af   : > { %v1322_v55 = vadd.f32 %v1321_v54, %v1219_v52  ;;  %v1341_v56 = vpop.f32.mrf.mxu1 }
 0x2b0   : > { %v1342_v35 = vadd.f32 %v1341_v56, %v1219_v52 }
 0x2b1   : > { %1388 = vst [vmem:[%s262_s10 + $0x20] sm:$0xff] %v1322_v55 }
 0x2b2   : > { %1389 = vst [vmem:[%s262_s10 + $0x28] sm:$0xff] %v1342_v35 }
 0x2c6   : > { %v1361_v58 = vpop.f32.mrf.mxu2 }
 0x2c7   : > { %v1362_v59 = vadd.f32 %v1361_v58, %v1219_v52  ;;  %v1381_v61 = vpop.f32.mrf.mxu3 }
 0x2c8   : > { %v1382_v62 = vadd.f32 %v1381_v61, %v1219_v52 }
 0x2c9   : > { %1390 = vst [vmem:[%s262_s10 + $0x30] sm:$0xff] %v1362_v59 }
 0x2ca   : > { %1391 = vst [vmem:[%s262_s10 + $0x38] sm:$0xff] %v1382_v62 }
 0x2cb   : > { %1757 = shalt.err (!%p1754_p13)
}
 0x2cc   : > { %1634 = dma.vmem_to_hbm [thread:$0]  (%p1898_p9), %s1409_s13, 1024, %s1411_s14, %s1393_s12  }
 0x2cd PF: > { %s1422_s29 = sand.u32 1, %s1792_s18   ;;  %p1641_p0 = pnand %p1498_p12, %p1905_p11 }
 0x2ce   : > { %s1423_s10 = scalar_lea.sflag [#allocation4], %s1422_s29 }
 0x2cf   : > { %p1642_p1 = pneg %p1641_p0 }
 0x2d1   : > { %1787 = dma.done.wait (%p1642_p1), %s1423_s10, 1024  }
 0x2d2   : > { %1789 = vsyncadd (%p1642_p1), %s1423_s10, 4294966272  ;;  %s21_s23 = sadd.s32 1, %s1812_s23   ;;  %s2438_s18 = smov %s1796_s19 }
 0x2d3   : > { %p18_p2 = scmp.ge.s32.totalorder %s21_s23, 4   ;;  %s2439_s19 = smov %s1800_s20 }
 0x2d4   : > { %s2440_s20 = smov %s1903_s7  ;;  %s2441_s21 = smov %s1808_s22 }
 0x2d5   : > { %s2442_s22 = smov %s2444_s26  ;;  %20 = sbr.rel (!%p18_p2) target bundleno = 6 (0x6), region = 89 }
 0x2da   :  { %1429 = vsyncpa [#allocation3], 1 }
 0x2db   :  { %1431 = vsyncpa [#allocation3 + $0x1], 1 }
 0x2dc   :  { %1432 = vsyncpa [#allocation4], 1 }
 0x2dd   :  { %1434 = vsyncpa [#allocation4 + $0x1], 1 }

</bundles_post_ra>
